<compile_context>
chip_gen: v7x
topology: tpu7x:2x2x1
jax: 0.10.0
libtpu: 0.0.40
codegen_flags: <defaults>
</compile_context>

<pallas_src>
import functools

import jax
import jax.numpy as jnp
from jax.experimental import pallas as pl
from jax.experimental.pallas import tpu as pltpu

_LANE = 128
_SUBLANE = 8
_TM = 512     # preferred row tile (multiple of 8)
_TN = 1024    # preferred N tile when weights cannot stay resident
_TK = 2048    # preferred K tile when weights cannot stay resident


def _round_up(x, m):
    return ((x + m - 1) // m) * m


def _vmem_budget_bytes():
    """Generation-aware scoped-VMEM budget (~75% of physical VMEM).

    v5e/v6e (128 MiB) -> ~96 MiB, v7x (64 MiB) -> ~48 MiB.  Falls back to the
    conservative v7x-sized budget if the hardware query is unavailable.
    """
    cap = None
    try:
        info = pltpu.get_tpu_info()
        for name in ("vmem_capacity_bytes", "vmem_size_bytes", "vmem_bytes"):
            cap = getattr(info, name, None)
            if cap:
                break
    except Exception:
        cap = None
    if not cap:
        cap = 64 * 1024 * 1024
    return int(cap) * 3 // 4


def _largest_tile(dim, cap, granule=_LANE):
    """Largest multiple-of-`granule` divisor of `dim` that is <= cap."""
    cap = max(granule, min(cap, dim))
    t = (cap // granule) * granule
    while dim % t:
        t -= granule
    return t


def _row_tile(m, pref=_TM):
    """Pick (m_pad, tm): tm multiple of 8 dividing m_pad.  Keep >= 2 row tiles
    whenever possible so the 'parallel' M axis feeds both v7x TensorCores."""
    m8 = _round_up(m, _SUBLANE)
    tm = min(pref, m8)
    while tm > _SUBLANE and _round_up(m8, tm) // tm < 2:
        tm = max(_SUBLANE, _round_up(tm // 2, _SUBLANE))
    return _round_up(m8, tm), tm


def _apply_activation(y, activation):
    if activation == "relu":
        return jnp.maximum(y, 0.0)
    if activation == "tanh":
        return jnp.tanh(y)
    return y


# ----------------------------------------------------------------------------
# kernel 1a: single-K-step layer (weight panel resident) -> no accumulator
# ----------------------------------------------------------------------------
def _linear_kernel_nok(x_ref, wt_ref, b_ref, o_ref, *, activation, compute_dtype):
    y = jnp.dot(x_ref[...].astype(compute_dtype), wt_ref[...],
                preferred_element_type=jnp.float32)
    y = _apply_activation(y + b_ref[...].astype(jnp.float32), activation)
    o_ref[...] = y.astype(o_ref.dtype)


# ----------------------------------------------------------------------------
# kernel 1b: tiled K-loop layer with f32 VMEM accumulator
# ----------------------------------------------------------------------------
def _linear_kernel_kloop(x_ref, wt_ref, b_ref, o_ref, acc_ref, *,
                         activation, compute_dtype):
    k = pl.program_id(2)

    @pl.when(k == 0)
    def _init():
        acc_ref[...] = jnp.zeros_like(acc_ref)

    acc_ref[...] += jnp.dot(x_ref[...].astype(compute_dtype), wt_ref[...],
                            preferred_element_type=jnp.float32)

    @pl.when(k == pl.num_programs(2) - 1)
    def _finalize():
        y = _apply_activation(acc_ref[...] + b_ref[...].astype(jnp.float32),
                              activation)
        o_ref[...] = y.astype(o_ref.dtype)


def _linear_pallas(x_pad, wt_pad, b_pad, activation, tm, out_dtype, budget):
    m_pad, k_pad = x_pad.shape
    kw, n_pad = wt_pad.shape
    assert kw == k_pad
    cdt = wt_pad.dtype
    xb = jnp.dtype(x_pad.dtype).itemsize
    cb = jnp.dtype(cdt).itemsize
    ob = jnp.dtype(out_dtype).itemsize

    def vmem_need(tk, tn, with_acc):
        need = (2 * tm * tk * xb          # x tile, double-buffered
                + 2 * tk * tn * cb        # weight tile, double-buffered
                + 2 * tn * 4              # bias tile
                + 2 * tm * tn * ob)       # output tile, double-buffered
        if with_acc:
            need += tm * tn * 4           # f32 accumulator scratch
        return need

    # Preferred: whole weight panel resident (constant block index -> one DMA).
    if vmem_need(k_pad, n_pad, False) <= budget:
        tk, tn = k_pad, n_pad
    else:
        tn = _largest_tile(n_pad, _TN)
        tk = _largest_tile(k_pad, _TK)
        while vmem_need(tk, tn, True) > budget and (tk > _LANE or tn > _LANE):
            if tk >= tn and tk > _LANE:
                tk = _largest_tile(k_pad, tk - _LANE)
            else:
                tn = _largest_tile(n_pad, tn - _LANE)

    grid_m = m_pad // tm
    grid_n = n_pad // tn
    resident = (tk == k_pad and tn == n_pad)
    refetch = 1 if resident else grid_m
    cost = pl.CostEstimate(
        flops=int(2 * m_pad * k_pad * n_pad),
        transcendentals=int(m_pad * n_pad) if activation == "tanh" else 0,
        bytes_accessed=int(x_pad.size * xb + wt_pad.size * cb * refetch
                           + b_pad.size * 4 + m_pad * n_pad * ob),
    )
    vmem_limit = int(max(budget, 32 * 1024 * 1024))
    out_shape = jax.ShapeDtypeStruct((m_pad, n_pad), out_dtype)

    if tk == k_pad:
        kernel = functools.partial(_linear_kernel_nok, activation=activation,
                                   compute_dtype=cdt)
        return pl.pallas_call(
            kernel,
            out_shape=out_shape,
            grid_spec=pltpu.PrefetchScalarGridSpec(
                num_scalar_prefetch=0,
                grid=(grid_m, grid_n),
                in_specs=[
                    pl.BlockSpec((tm, k_pad), lambda i, j: (i, 0)),
                    pl.BlockSpec((k_pad, tn), lambda i, j: (0, j)),
                    pl.BlockSpec((1, tn), lambda i, j: (0, j)),
                ],
                out_specs=pl.BlockSpec((tm, tn), lambda i, j: (i, j)),
            ),
            compiler_params=pltpu.CompilerParams(
                dimension_semantics=("parallel", "parallel"),
                vmem_limit_bytes=vmem_limit),
            cost_estimate=cost,
        )(x_pad, wt_pad, b_pad)

    kernel = functools.partial(_linear_kernel_kloop, activation=activation,
                               compute_dtype=cdt)
    return pl.pallas_call(
        kernel,
        out_shape=out_shape,
        grid_spec=pltpu.PrefetchScalarGridSpec(
            num_scalar_prefetch=0,
            grid=(grid_m, grid_n, k_pad // tk),
            in_specs=[
                pl.BlockSpec((tm, tk), lambda i, j, k: (i, k)),
                pl.BlockSpec((tk, tn), lambda i, j, k: (k, j)),
                pl.BlockSpec((1, tn), lambda i, j, k: (0, j)),
            ],
            out_specs=pl.BlockSpec((tm, tn), lambda i, j, k: (i, j)),
            scratch_shapes=[pltpu.VMEM((tm, tn), jnp.float32)],
        ),
        compiler_params=pltpu.CompilerParams(
            dimension_semantics=("parallel", "parallel", "arbitrary"),
            vmem_limit_bytes=vmem_limit),
        cost_estimate=cost,
    )(x_pad, wt_pad, b_pad)


# ----------------------------------------------------------------------------
# kernel 2: fused layer stack (layers share the same padded square shape);
#           inter-layer activation lives in a bf16 VMEM scratch.
# ----------------------------------------------------------------------------
def _fused_stack_kernel(x_ref, wt_ref, b_ref, o_ref, h_ref, *,
                        activation, resident):
    l = pl.program_id(1)

    @pl.when(l == 0)
    def _load_input():
        h_ref[...] = x_ref[...].astype(h_ref.dtype)

    if resident:
        w = wt_ref[l]       # dynamic index into the VMEM-resident weight stack
        b = b_ref[l]
    else:
        w = wt_ref[0]       # streamed per-layer block
        b = b_ref[0]

    y = jnp.dot(h_ref[...], w, preferred_element_type=jnp.float32)
    y = _apply_activation(y + b.astype(jnp.float32), activation)
    h_ref[...] = y.astype(h_ref.dtype)

    @pl.when(l == pl.num_programs(1) - 1)
    def _store_output():
        o_ref[...] = y.astype(o_ref.dtype)   # final layer stored from f32


def _fused_stack_pallas(x_pad, wt_stack, b_stack, activation, tm, out_dtype,
                        budget, resident):
    m_pad, d = x_pad.shape
    num_layers = wt_stack.shape[0]
    cdt = wt_stack.dtype
    xb = jnp.dtype(x_pad.dtype).itemsize
    cb = jnp.dtype(cdt).itemsize
    ob = jnp.dtype(out_dtype).itemsize

    grid_m = m_pad // tm
    refetch = 1 if resident else grid_m
    cost = pl.CostEstimate(
        flops=int(2 * m_pad * d * d * num_layers),
        transcendentals=int(m_pad * d * num_layers) if activation == "tanh" else 0,
        bytes_accessed=int(x_pad.size * xb + wt_stack.size * cb * refetch
                           + b_stack.size * 4 + m_pad * d * ob),
    )

    if resident:
        w_spec = pl.BlockSpec((num_layers, d, d), lambda i, l: (0, 0, 0))
        b_spec = pl.BlockSpec((num_layers, 1, d), lambda i, l: (0, 0, 0))
    else:
        w_spec = pl.BlockSpec((1, d, d), lambda i, l: (l, 0, 0))
        b_spec = pl.BlockSpec((1, 1, d), lambda i, l: (l, 0, 0))

    kernel = functools.partial(_fused_stack_kernel, activation=activation,
                               resident=resident)
    return pl.pallas_call(
        kernel,
        out_shape=jax.ShapeDtypeStruct((m_pad, d), out_dtype),
        grid_spec=pltpu.PrefetchScalarGridSpec(
            num_scalar_prefetch=0,
            grid=(grid_m, num_layers),
            in_specs=[
                pl.BlockSpec((tm, d), lambda i, l: (i, 0)),
                w_spec,
                b_spec,
            ],
            out_specs=pl.BlockSpec((tm, d), lambda i, l: (i, 0)),
            scratch_shapes=[pltpu.VMEM((tm, d), cdt)],   # bf16 inter-layer act
        ),
        compiler_params=pltpu.CompilerParams(
            dimension_semantics=("parallel", "arbitrary"),
            vmem_limit_bytes=int(max(budget, 32 * 1024 * 1024))),
        cost_estimate=cost,
    )(x_pad, wt_stack, b_stack)


# ----------------------------------------------------------------------------
# module wrapper
# ----------------------------------------------------------------------------
class LinearStack:
    """JAX/Pallas port of the PyTorch `Linear` module (forward pass only).

    NOTE: the reference module never updates `prev_dim` inside its layer loop,
    so every layer is built with in_features=input_dim; we reproduce that
    faithfully (multi-layer forward only works when intermediate hidden dims
    equal input_dim).  Dropout is inference-mode (identity).
    """

    def __init__(self, key, dropout, input_dim, hidden_dims, num_layers=None,
                 activation=None, dtype=jnp.float32, compute_dtype=jnp.bfloat16):
        del dropout  # TODO(synk): training-mode dropout (pltpu.prng_*) not implemented; eval-mode identity.
        if num_layers:
            assert isinstance(num_layers, int)
            if num_layers > 1:
                assert len(hidden_dims) == num_layers
            else:
                assert isinstance(hidden_dims, int)
        if isinstance(hidden_dims, int):
            hidden_dims = [hidden_dims]
        assert activation in (None, "relu", "tanh")
        # Reference builds every layer with in_features=input_dim; its forward
        # only chains when intermediate hidden dims equal input_dim.
        for i in range(1, len(hidden_dims)):
            assert hidden_dims[i - 1] == input_dim, (
                "reference module requires intermediate hidden dims == input_dim")
        self.activation = activation
        self.dtype = dtype
        self.compute_dtype = compute_dtype
        self._budget = _vmem_budget_bytes()

        self.raw_params = []      # (W (N,K) f32, b (N,) f32) — PyTorch layout
        self.padded_params = []   # lane-dense bf16 transposed weights + f32 bias
        prev_dim = input_dim      # never updated — matches the reference code
        for h in hidden_dims:
            key, wk, bk = jax.random.split(key, 3)
            bound = 1.0 / (prev_dim ** 0.5)   # PyTorch nn.Linear default init
            w = jax.random.uniform(wk, (h, prev_dim), dtype, -bound, bound)
            b = jax.random.uniform(bk, (h,), dtype, -bound, bound)
            self.raw_params.append((w, b))

            k_pad = _round_up(prev_dim, _LANE)
            n_pad = _round_up(h, _LANE)
            wt_pad = (jnp.zeros((k_pad, n_pad), compute_dtype)
                      .at[:prev_dim, :h].set(w.T.astype(compute_dtype)))
            b_pad = (jnp.zeros((1, n_pad), jnp.float32)
                     .at[:, :h].set(b.astype(jnp.float32)))
            self.padded_params.append(dict(wt=wt_pad, b=b_pad, n=h, k=prev_dim))

        shapes = {p["wt"].shape for p in self.padded_params}
        self._fusable = (len(self.padded_params) > 1
                         and len(shapes) == 1
                         and self.padded_params[0]["wt"].shape[0]
                         == self.padded_params[0]["wt"].shape[1])
        if self._fusable:
            self._wt_stack = jnp.stack([p["wt"] for p in self.padded_params])
            self._b_stack = jnp.stack([p["b"] for p in self.padded_params])

    def _fused_plan(self, tm, budget):
        """Choose 'resident' (whole weight stack in VMEM), 'streamed', or None."""
        num_layers, d, _ = self._wt_stack.shape
        cb = jnp.dtype(self.compute_dtype).itemsize
        xb = jnp.dtype(self.dtype).itemsize
        ob = jnp.dtype(self.dtype).itemsize
        base = (2 * tm * d * xb            # input blocks (double-buffered)
                + 2 * tm * d * ob          # output blocks
                + tm * d * cb              # bf16 inter-layer scratch
                + 2 * num_layers * d * 4)  # bias stack (worst case)
        if base + 2 * num_layers * d * d * cb <= budget:
            return "resident"
        if base + 2 * d * d * cb <= budget:
            return "streamed"
        return None

    def __call__(self, x):
        lead = x.shape[:-1]
        x2 = x.reshape(-1, x.shape[-1]).astype(self.dtype)
        m, k_in = x2.shape
        first = self.padded_params[0]
        assert k_in == first["k"], "input feature dim mismatch"

        m_pad, tm = _row_tile(m)
        k0_pad = first["wt"].shape[0]
        budget = self._budget

        # Skip the wrapper-side pad (an extra HBM round trip) when possible.
        if m_pad == m and k0_pad == k_in:
            h_pad = x2
        else:
            h_pad = jnp.zeros((m_pad, k0_pad), self.dtype).at[:m, :k_in].set(x2)

        last_n = self.padded_params[-1]["n"]

        plan = self._fused_plan(tm, budget) if self._fusable else None
        if plan is not None:
            out_pad = _fused_stack_pallas(h_pad, self._wt_stack, self._b_stack,
                                          self.activation, tm, self.dtype,
                                          budget, resident=(plan == "resident"))
        else:
            out_pad = h_pad
            for p in self.padded_params:
                assert out_pad.shape[1] == p["wt"].shape[0], (
                    "padded layer input dim mismatch")
                out_pad = _linear_pallas(out_pad, p["wt"], p["b"],
                                         self.activation, tm, self.dtype,
                                         budget)
            # dropout: identity (eval mode)

        if m_pad == m and out_pad.shape[1] == last_n:
            out = out_pad
        else:
            out = out_pad[:m, :last_n]
        return out.reshape(*lead, last_n)


# ----------------------------------------------------------------------------
# self-test
# ----------------------------------------------------------------------------
if __name__ == "__main__":
    key = jax.random.PRNGKey(0)
    k_in, k_p1, k_p2, k_p3, k_in3 = jax.random.split(key, 5)

    CDT = jnp.bfloat16
    batch, seq, input_dim = 2, 8, 32
    x = jax.random.normal(k_in, (batch, seq, input_dim), jnp.float32)

    # 1) multi-layer stack -> fused, VMEM-resident weight-stack kernel
    model = LinearStack(k_p1, dropout=0.1, input_dim=input_dim,
                        hidden_dims=[32, 32], num_layers=2, activation="relu")
    out = jax.block_until_ready(model(x))
    h = x.reshape(-1, input_dim).astype(CDT)
    y = None
    for w, b in model.raw_params:
        y = jnp.dot(h, w.T.astype(CDT), preferred_element_type=jnp.float32) + b
        y = jnp.maximum(y, 0.0)
        h = y.astype(CDT)
    ref = y.reshape(batch, seq, -1)
    assert out.shape == (batch, seq, 32)
    assert jnp.allclose(out, ref, atol=1e-2, rtol=1e-2)

    # 2) single layer with tanh -> resident single-shot (no-K-loop) kernel
    model1 = LinearStack(k_p2, dropout=0.0, input_dim=input_dim,
                         hidden_dims=64, num_layers=1, activation="tanh")
    out1 = jax.block_until_ready(model1(x))
    w1, b1 = model1.raw_params[0]
    y1 = jnp.dot(x.reshape(-1, input_dim).astype(CDT), w1.T.astype(CDT),
                 preferred_element_type=jnp.float32) + b1
    ref1 = jnp.tanh(y1).reshape(batch, seq, 64)
    assert out1.shape == (batch, seq, 64)
    assert jnp.allclose(out1, ref1, atol=1e-2, rtol=1e-2)

    # 3) wide single layer with an artificially tiny tile budget -> exercises
    #    the K-loop accumulator kernel and the pad-free input/output path.
    wide = 256
    x3 = jax.random.normal(k_in3, (batch, seq, wide), jnp.float32)
    model3 = LinearStack(k_p3, dropout=0.0, input_dim=wide,
                         hidden_dims=wide, num_layers=1, activation=None)
    model3._budget = 200 * 1024            # force tk < k_pad (tile selection only)
    out3 = jax.block_until_ready(model3(x3))
    w3, b3 = model3.raw_params[0]
    y3 = jnp.dot(x3.reshape(-1, wide).astype(CDT), w3.T.astype(CDT),
                 preferred_element_type=jnp.float32) + b3
    ref3 = y3.reshape(batch, seq, wide)
    assert out3.shape == (batch, seq, wide)
    assert jnp.allclose(out3, ref3, atol=1e-2, rtol=1e-2)

    print("KERNEL_OK")
</pallas_src>

<mosaic_0001>
module attributes {stable_mosaic.version = 11 : i64} {
  func.func @_fused_stack_kernel(%arg0: i32, %arg1: i32, %arg2: memref<8x128xf32, #tpu.memory_space<vmem>>, %arg3: memref<2x128x128xbf16, #tpu.memory_space<vmem>>, %arg4: memref<2x1x128xf32, #tpu.memory_space<vmem>>, %arg5: memref<8x128xf32, #tpu.memory_space<vmem>>, %arg6: memref<8x128xbf16, #tpu.memory_space<vmem>>) attributes {dimension_semantics = [#tpu.dimension_semantics<parallel>, #tpu.dimension_semantics<arbitrary>], iteration_bounds = array<i64: 2, 2>, scalar_prefetch = 0 : i64, scratch_operands = 1 : i64, tpu.core_type = #tpu.core_type<tc>, window_params = [{transform_indices = @transform_0, window_bounds = array<i64: 8, 128>}, {pipeline_mode = #tpu.pipeline_mode<synchronous>, transform_indices = @transform_1, window_bounds = array<i64: 2, 128, 128>}, {pipeline_mode = #tpu.pipeline_mode<synchronous>, transform_indices = @transform_2, window_bounds = array<i64: 2, 1, 128>}, {transform_indices = @transform_3, window_bounds = array<i64: 8, 128>}]} {
    %c0_i32 = arith.constant 0 : i32
    %0 = arith.cmpi eq, %arg1, %c0_i32 : i32
    %1 = arith.extui %0 : i1 to i32
    %c0_i32_0 = arith.constant 0 : i32
    %2 = arith.cmpi ne, %1, %c0_i32_0 : i32
    scf.if %2 {
      %c0_10 = arith.constant 0 : index
      %c0_11 = arith.constant 0 : index
      %20 = vector.load %arg2[%c0_10, %c0_11] : memref<8x128xf32, #tpu.memory_space<vmem>>, vector<8x128xf32>
      %21 = arith.truncf %20 : vector<8x128xf32> to vector<8x128xbf16>
      %c0_12 = arith.constant 0 : index
      %c0_13 = arith.constant 0 : index
      %22 = vector.load %arg6[%c0_12, %c0_13] : memref<8x128xbf16, #tpu.memory_space<vmem>>, vector<8x128xbf16>
      tpu.vector_store %arg6[%c0_12, %c0_13], %21 {strides = array<i32>} : memref<8x128xbf16, #tpu.memory_space<vmem>>, vector<8x128xbf16>,
    } else {
    }
    %3 = arith.index_cast %arg1 : i32 to index
    %c0 = arith.constant 0 : index
    %c0_1 = arith.constant 0 : index
    %4 = vector.load %arg3[%3, %c0, %c0_1] : memref<2x128x128xbf16, #tpu.memory_space<vmem>>, vector<1x128x128xbf16>
    %5 = vector.shape_cast %4 : vector<1x128x128xbf16> to vector<128x128xbf16>
    %6 = arith.index_cast %arg1 : i32 to index
    %c0_2 = arith.constant 0 : index
    %c0_3 = arith.constant 0 : index
    %7 = vector.load %arg4[%6, %c0_2, %c0_3] : memref<2x1x128xf32, #tpu.memory_space<vmem>>, vector<1x1x128xf32>
    %8 = vector.shape_cast %7 : vector<1x1x128xf32> to vector<1x128xf32>
    %c0_4 = arith.constant 0 : index
    %c0_5 = arith.constant 0 : index
    %9 = vector.load %arg6[%c0_4, %c0_5] : memref<8x128xbf16, #tpu.memory_space<vmem>>, vector<8x128xbf16>
    %cst = arith.constant dense<0.000000e+00> : vector<8x128xf32>
    %10 = tpu.matmul %9, %5, %cst {dimension_numbers = #tpu.dot_dimension_numbers<[1], [0], [0], [1], [0, 0, 1, 1], [], []>} : vector<8x128xbf16>, vector<128x128xbf16>, vector<8x128xf32> -> vector<8x128xf32>
    %11 = vector.broadcast %8 : vector<1x128xf32> to vector<8x128xf32>
    %12 = arith.addf %10, %11 : vector<8x128xf32>
    %cst_6 = arith.constant 0.000000e+00 : f32
    %13 = vector.broadcast %cst_6 : f32 to vector<8x128xf32>
    %14 = arith.maximumf %12, %13 : vector<8x128xf32>
    %15 = arith.truncf %14 : vector<8x128xf32> to vector<8x128xbf16>
    %c0_7 = arith.constant 0 : index
    %c0_8 = arith.constant 0 : index
    %16 = vector.load %arg6[%c0_7, %c0_8] : memref<8x128xbf16, #tpu.memory_space<vmem>>, vector<8x128xbf16>
    tpu.vector_store %arg6[%c0_7, %c0_8], %15 {strides = array<i32>} : memref<8x128xbf16, #tpu.memory_space<vmem>>, vector<8x128xbf16>,
    %c1_i32 = arith.constant 1 : i32
    %17 = arith.cmpi eq, %arg1, %c1_i32 : i32
    %18 = arith.extui %17 : i1 to i32
    %c0_i32_9 = arith.constant 0 : i32
    %19 = arith.cmpi ne, %18, %c0_i32_9 : i32
    scf.if %19 {
      %c0_10 = arith.constant 0 : index
      %c0_11 = arith.constant 0 : index
      %20 = vector.load %arg5[%c0_10, %c0_11] : memref<8x128xf32, #tpu.memory_space<vmem>>, vector<8x128xf32>
      tpu.vector_store %arg5[%c0_10, %c0_11], %14 {strides = array<i32>} : memref<8x128xf32, #tpu.memory_space<vmem>>, vector<8x128xf32>,
    } else {
    }
    return
  }
  func.func @transform_0(%arg0: i32, %arg1: i32) -> (i32, i32) {
    %c0_i32 = arith.constant 0 : i32
    %c0_i32_0 = arith.constant 0 : i32
    return %arg0, %c0_i32 : i32, i32
  }
  func.func @transform_1(%arg0: i32, %arg1: i32) -> (i32, i32, i32) {
    %c0_i32 = arith.constant 0 : i32
    %c0_i32_0 = arith.constant 0 : i32
    %c0_i32_1 = arith.constant 0 : i32
    %c0_i32_2 = arith.constant 0 : i32
    return %c0_i32, %c0_i32_0, %c0_i32_1 : i32, i32, i32
  }
  func.func @transform_2(%arg0: i32, %arg1: i32) -> (i32, i32, i32) {
    %c0_i32 = arith.constant 0 : i32
    %c0_i32_0 = arith.constant 0 : i32
    %c0_i32_1 = arith.constant 0 : i32
    %c0_i32_2 = arith.constant 0 : i32
    return %c0_i32, %c0_i32_0, %c0_i32_1 : i32, i32, i32
  }
  func.func @transform_3(%arg0: i32, %arg1: i32) -> (i32, i32) {
    %c0_i32 = arith.constant 0 : i32
    %c0_i32_0 = arith.constant 0 : i32
    return %arg0, %c0_i32 : i32, i32
  }
}

</mosaic_0001>

<bundles_post_ra>
// kernel: tpu_custom_call.1
= control target key start
LH: loop header
LB: loop body
LE: loop exit
PB: predicated region body
PF: predicated region fallthrough
CT: control target
= control target key end

     0   :  { %8 = vsyncpa [#allocation4], 0  ;;  %s1034_s0 = inlined_call_operand.hbm [shape: f32[16,128], index: 0, kind: input, shape index: {}]   ;;  %s1035_s1 = inlined_call_operand.hbm [shape: bf16[2,128,128], index: 1, kind: input, shape index: {}]   ;;  %s1036_s2 = inlined_call_operand.vmem [shape: f32[2,1,128], index: 2, kind: input, shape index: {}]   ;;  %s1037_s3 = inlined_call_operand.hbm [shape: f32[16,128], index: 3, kind: output, shape index: {}]  }
   0x1   :  { %10 = vsyncpa [#allocation4 + $0x1], 0 }
   0x2   :  { %11 = vsyncpa [#allocation7], 0 }
   0x3   :  { %12 = vsyncpa [#allocation5], 0 }
   0x4   :  { %14 = vsyncpa [#allocation5 + $0x1], 0  ;;  %s801_s12 = smov 0   ;;  %s803_s13 = smov 0  }
   0x5   :  { %s805_s14 = smov 0   ;;  %s807_s15 = smov 0  }
   0x6   :  { %s809_s16 = smov 0   ;;  %s811_s17 = smov 0  }
   0x7   :  { %s813_s18 = smov 0   ;;  %s815_s19 = smov 0  }
   0x8 LB: > { %s453_s20 = sadd.s32 4294967295, %s772_s19   ;;  %s454_s21 = sadd.s32 4294967294, %s772_s19   ;;  %s772_s19 = sphi %s815_s19, %s20_s19   ;;  %s768_s18 = sphi %s813_s18, %s1061_s18   ;;  %s764_s17 = sphi %s811_s17, %s1060_s17   ;;  %s760_s16 = sphi %s809_s16, %s1059_s16   ;;  %s756_s15 = sphi %s807_s15, %s1058_s15   ;;  %s752_s14 = sphi %s805_s14, %s1057_s14   ;;  %s748_s13 = sphi %s803_s13, %s1056_s13   ;;  %s744_s12 = sphi %s801_s12, %s1055_s12  }
   0x9   : > { %p52_p0 = scmp.ne.s32.totalorder %s748_s13, %s744_s12  ;;  %p845_p1 = scmp.eq.s32.totalorder %s453_s20, 0 }
   0xa   : > { %p849_p2 = scmp.eq.s32.totalorder %s453_s20, 3  ;;  %p124_p3 = scmp.eq.s32.totalorder %s454_s21, 3 }
   0xb   : > { %s1042_s22 = scalar_select %p845_p1, 1, 0 }
   0xc   : > { %s1043_s23 = scalar_select %p849_p2, 1, 0 }
   0xd   : > { %p855_p4 = por %p845_p1, %p52_p0  ;;  %p455_p5 = scmp.ge.s32.totalorder %s772_s19, 1 }
   0xe   : > { %p860_p6 = por %p124_p3, %p52_p0  ;;  %p131_p7 = scmp.lt.s32.totalorder %s772_s19, 5 }
   0xf   : > { %s1044_s24 = scalar_select %p855_p4, 1, 0 }
  0x10   : > { %s1045_s25 = scalar_select %p860_p6, 1, 0 }
  0x11   : > { %p865_p8 = pnand %p455_p5, %p131_p7  ;;  %s774_s27 = smov [#allocation6]  }
  0x12   : > { %s143_s28 = sshll.u32 %s774_s27, 4  ;;  %s612_s5 = scalar_lea.hbm %s1035_s1, 2048  ;;  %s144_s28 = int_to_ptr.vmem [resolvable:$true] %s143_s28 }
  0x13   : > { %s1046_s26 = scalar_select %p865_p8, 1, 0 }
  0x14   : > { %p519_p9 = pneg %p865_p8  ;;  %p613_p11 = scmp.ne.s32.totalorder %s1035_s1, %s612_s5 }
  0x15   : > { %p619_p3 = scmp.lt.u32.totalorder %s612_s5, %s1035_s1 }
  0x16   : > { %p873_p10 = pnand %p519_p9, %p845_p1 }
  0x18   : > { %p614_p12 = pneg %p873_p10 }
  0x1a   : > { %p615_p13 = pnand %p614_p12, %p613_p11 }
  0x1c   : > { %p616_p0 = pneg %p615_p13 }
  0x1e   : > { %p621_p5 = pnand %p619_p3, %p616_p0 }
  0x20   : > { %624 = shalt.err (!%p621_p5)
}
  0x21   : > { %s625_s10 = scalar_lea.vmem %s144_s28, 2048  ;;  %p633_p1 = scmp.lt.s32.totalorder %s144_s28, %s144_s28 }
  0x22   : > { %p626_p7 = scmp.ne.s32.totalorder %s144_s28, %s625_s10  ;;  %p634_p4 = scmp.lt.s32.totalorder %s625_s10, %s625_s10 }
  0x24   : > { %p628_p9 = pnand %p626_p7, %p614_p12  ;;  %p635_p8 = por %p634_p4, %p633_p1 }
  0x26   : > { %p629_p6 = pneg %p628_p9 }
  0x28   : > { %p636_p2 = pnand %p635_p8, %p629_p6 }
  0x2a   : > { %639 = shalt.err (!%p636_p2)
}
  0x2b   : > { %s775_s11 = smov 64   ;;  %s776_s20 = smov 4  }
  0x2c   : > { %522 = dma.hbm_to_vmem [thread:$0]  (!%p873_p10), %s1035_s1, 2048, %s144_s28, [#allocation7], %s775_s11, %s775_s11, %s776_s20  }
  0x2d   : > { %s29_s30 = sadd.s32 1, %s764_s17  ;;  %s32_s4 = sadd.s32 1, %s768_s18 }
  0x2e   : > { %p30_p1 = scmp.ge.s32.totalorder %s29_s30, 2  ;;  %s39_s5 = sadd.s32 1, %s752_s14 }
  0x2f   : > { %p46_p2 = scmp.ne.s32.totalorder %s752_s14, %s748_s13  ;;  %p47_p4 = scmp.eq.s32.totalorder %s772_s19, 0 }
  0x30   : > { %s1063_s30 = smov (%p30_p1, %s29_s30), 0  ;;  %s1065_s4 = smov (!%p30_p1, %s32_s4), %s768_s18 }
  0x31   : > { %p1048_p6 = scmp.ne.s32.totalorder %s1043_s23, 0  ;;  %p34_p11 = scmp.ge.s32.totalorder %s1065_s4, 2 }
  0x32   : > { %p532_p10 = scmp.lt.s32.totalorder %s772_s19, 4  ;;  %p48_p12 = por %p47_p4, %p46_p2 }
  0x33   : > { %p904_p8 = por %p1048_p6, %p46_p2  ;;  %s160_s28 = sand.u32 1, %s752_s14  }
  0x34   : > { %s1067_s4 = smov (%p34_p11, %s1065_s4), 0  ;;  %s458_s6 = sshll.u32 %s160_s28, 3 }
  0x35   : > { %s36_s7 = ssub.s32 %s768_s18, %s1067_s4  ;;  %s459_s8 = sshll.u32 %s768_s18, 7 }
  0x36   : > { %p37_p13 = scmp.eq.s32.totalorder %s36_s7, 0  ;;  %s918_s23 = scalar_lea.hbm %s1034_s0, %s459_s8 }
  0x37   : > { %s164_s11 = scalar_lea.vmem [#allocation3], %s458_s6  ;;  %p927_p0 = pnand %p532_p10, %p48_p12 }
  0x38   : > { %s171_s20 = sshll.u32 %s164_s11, 4  ;;  %s161_s7 = scalar_lea.sflag [#allocation4], %s160_s28  ;;  %s923_s20 = int_to_ptr.vmem [resolvable:$true] %s171_s20 }
  0x39   : > { %s921_s21 = scalar_select %p37_p13, %s752_s14, %s39_s5  }
  0x3a   : > { %s640_s8 = scalar_lea.hbm %s918_s23, 128  ;;  %p642_p5 = pneg %p927_p0 }
  0x3b   : > { %p641_p3 = scmp.ne.s32.totalorder %s918_s23, %s640_s8  ;;  %s645_s9 = scalar_lea.hbm %s1034_s0, 256 }
  0x3c   : > { %p646_p1 = scmp.lt.u32.totalorder %s918_s23, %s1034_s0  ;;  %p647_p2 = scmp.lt.u32.totalorder %s645_s9, %s640_s8 }
  0x3d   : > { %p643_p7 = pnand %p642_p5, %p641_p3  ;;  %p649_p6 = scmp.lt.u32.totalorder %s640_s8, %s918_s23 }
  0x3e   : > { %p648_p4 = por %p647_p2, %p646_p1 }
  0x3f   : > { %p644_p9 = pneg %p643_p7 }
  0x40   : > { %p650_p11 = por %p649_p6, %p648_p4 }
  0x42   : > { %p651_p10 = pnand %p650_p11, %p644_p9 }
  0x44   : > { %654 = shalt.err (!%p651_p10)
}
  0x45   : > { %s655_s28 = scalar_lea.vmem %s923_s20, 128  ;;  %s777_s5 = smov [#allocation3]  }
  0x46   : > { %p656_p12 = scmp.ne.s32.totalorder %s923_s20, %s655_s28  ;;  %s660_s6 = sshll.u32 %s777_s5, 4  ;;  %s661_s6 = int_to_ptr.vmem [resolvable:$false] %s660_s6 }
  0x47   : > { %s662_s10 = scalar_lea.vmem %s661_s6, 256  ;;  %p663_p7 = scmp.lt.s32.totalorder %s923_s20, %s661_s6 }
  0x48   : > { %p658_p13 = pnand %p656_p12, %p642_p5  ;;  %p664_p1 = scmp.lt.s32.totalorder %s662_s10, %s655_s28 }
  0x4a   : > { %p659_p3 = pneg %p658_p13  ;;  %p665_p2 = por %p664_p1, %p663_p7 }
  0x4c   : > { %p666_p4 = pnand %p665_p2, %p659_p3 }
  0x4e   : > { %669 = shalt.err (!%p666_p4)
}
  0x4f   : > { %526 = dma.hbm_to_vmem [thread:$0]  (!%p927_p0), %s918_s23, 128, %s923_s20, %s161_s7  }
  0x50   : > { %p1051_p9 = scmp.ne.s32.totalorder %s1046_s26, 0 }
  0x51   : > { %s959_s8 = sand.u32 (!%p1051_p9), 1, %s748_s13   ;;  %p1052_p5 = scmp.ne.s32.totalorder (!%p1051_p9), %s1044_s24, 0 }
  0x52   : > { %180 = sbr.rel (%p1051_p9) target bundleno = 379 (0x17b), region = 32  ;;  %s461_s9 = sshll.u32 (!%p1051_p9), %s959_s8, 3 }
  0x53   : > { %s183_s11 = scalar_lea.sflag (!%p1051_p9), [#allocation4], %s959_s8  ;;  %s186_s28 = scalar_lea.vmem (!%p1051_p9), [#allocation3], %s461_s9 }
  0x59   : > { %731 = dma.done.wait (%p1052_p5), %s183_s11, 128  }
  0x5a   : > { %733 = vsyncadd (%p1052_p5), %s183_s11, 4294967168  ;;  %p1053_p6 = scmp.ne.s32.totalorder %s1042_s22, 0 }
  0x5c   : > { %735 = dma.done.wait (%p1053_p6), [#allocation7], 2048  }
  0x5d   : > { %737 = vsyncadd (%p1053_p6), [#allocation7], 4294965248  ;;  %s971_s26 = scalar_lea.vmem [#allocation8], %s461_s9  ;;  %p464_p0 = scmp.ne.s32.totalorder %s756_s15, 0 }
  0x5e   : > { %v218_v0 = vld [vmem:[%s186_s28] sm:$0xff] (!%p464_p0) }
  0x5f   : > { %217 = sbr.rel (%p464_p0) target bundleno = 102 (0x66), region = 44  ;;  %v219_v1 = vpack.c.bf16 (!%p464_p0), %v218_v0, %v218_v0 }
  0x61   : > { %220 = vst [vmem:[#allocation2] sm:$0xf] (!%p464_p0), %v219_v1 }
  0x66 PF: > { %s481_s23 = sshll.u32 %s756_s15, 6  ;;  %v778_v2 = vmov 0.0   ;;  %vm779_vm0 = vmmov 0   ;;  %s240_s27 = scalar_lea.vmem %s1036_s2, %s756_s15 }
  0x67   : > { %491 = vmatprep.subr.bf16.mxu0 %v778_v2  ;;  %507 = vmatprep.mubr.msk.bf16.mxu0 %vm779_vm0, %v778_v2  ;;  %s223_s24 = scalar_lea.vmem [#allocation6], %s481_s23  ;;  %v467_v12 = vld [vmem:[%s240_s27] ss:$0 sm:$0xff]  ;;  %p476_p11 = scmp.ne.s32.totalorder %s756_s15, 1 }
  0x68   : > { %v604_v3 = vld [vmem:[%s223_s24] sm:$0xff]   ;;  %v605_v4 = vld [vmem:[%s223_s24 + $0x8] sm:$0xff]   ;;  %v606_v5 = vld [vmem:[%s223_s24 + $0x10] sm:$0xff]  }
  0x69   : > { %492 = vmatpush3.bf16.msra.mxu0 %v604_v3  ;;  %v607_v6 = vld [vmem:[%s223_s24 + $0x18] sm:$0xff]   ;;  %v608_v7 = vld [vmem:[%s223_s24 + $0x20] sm:$0xff]   ;;  %v609_v8 = vld [vmem:[%s223_s24 + $0x28] sm:$0xff]  }
  0x6a   : > { %493 = vmatprep.subr.bf16.mxu0 %v778_v2  ;;  %v610_v9 = vld [vmem:[%s223_s24 + $0x30] sm:$0xff]   ;;  %v611_v10 = vld [vmem:[%s223_s24 + $0x38] sm:$0xff]   ;;  %v242_v11 = vld [vmem:[#allocation2] sm:$0xf] }
  0x6d   : > { %494 = vmatpush3.bf16.msra.mxu0 %v605_v4 }
  0x6e   : > { %495 = vmatprep.subr.bf16.mxu0 %v778_v2 }
  0x71   : > { %496 = vmatpush3.bf16.msra.mxu0 %v606_v5 }
  0x72   : > { %497 = vmatprep.subr.bf16.mxu0 %v778_v2 }
  0x75   : > { %498 = vmatpush3.bf16.msra.mxu0 %v607_v6 }
  0x76   : > { %499 = vmatprep.subr.bf16.mxu0 %v778_v2 }
  0x79   : > { %500 = vmatpush3.bf16.msra.mxu0 %v608_v7 }
  0x7a   : > { %501 = vmatprep.subr.bf16.mxu0 %v778_v2 }
  0x7d   : > { %502 = vmatpush3.bf16.msra.mxu0 %v609_v8 }
  0x7e   : > { %503 = vmatprep.subr.bf16.mxu0 %v778_v2 }
  0x81   : > { %504 = vmatpush3.bf16.msra.mxu0 %v610_v9 }
  0x82   : > { %505 = vmatprep.subr.bf16.mxu0 %v778_v2 }
  0x85   : > { %506 = vmatpush3.bf16.msra.mxu0 %v611_v10 }
  0x88   : > { %508 = vmatmul.mubr.bf16.vlgmr.msra.gmra.mrb[0].mxu0 %v242_v11 }
 0x15b   : > { %v331_v13 = vpop.f32.mrb[0].mxu0 }
 0x15c   : > { %v332_v14 = vadd.f32 %v467_v12, %v331_v13  ;;  %v509_v15 = vpop.f32.mrb[1].mxu0  ;;  %343 = sbr.rel (%p476_p11) target bundleno = 355 (0x163), region = 48 }
 0x15d   : > { %v334_v16 = vpop.f32.mrb[2].mxu0 }
 0x15e   : > { %v337_v17 = vmax.f32 %v332_v14, 0.0  ;;  %v510_v18 = vpop.f32.mrb[3].mxu0 }
 0x160   : > { %v338_v19 = vpack.c.bf16 %v337_v17, %v337_v17  ;;  %344 = vst [vmem:[%s971_s26] sm:$0xff] (!%p476_p11), %v337_v17 }
 0x162   : > { %339 = vst [vmem:[#allocation2] sm:$0xf] %v338_v19 }
 0x163 PF: > { %s478_s7 = sshll.u32 %s760_s16, 7  ;;  %s359_s9 = sshll.u32 %s971_s26, 4  ;;  %s360_s9 = int_to_ptr.vmem [resolvable:$true] %s359_s9 }
 0x164   : > { %s985_s10 = scalar_lea.hbm %s1037_s3, %s478_s7  ;;  %s346_s11 = scalar_lea.sflag [#allocation5], %s959_s8 }
 0x165   : > { %s670_s28 = scalar_lea.vmem %s360_s9, 128  ;;  %s780_s15 = smov [#allocation8]  }
 0x166   : > { %p671_p10 = scmp.ne.s32.totalorder %s360_s9, %s670_s28  ;;  %s674_s23 = sshll.u32 %s780_s15, 4  ;;  %s675_s23 = int_to_ptr.vmem [resolvable:$false] %s674_s23 }
 0x167   : > { %s676_s24 = scalar_lea.vmem %s675_s23, 256  ;;  %p677_p3 = scmp.lt.s32.totalorder %s360_s9, %s675_s23 }
 0x168   : > { %p672_p12 = pnand %p671_p10, %p904_p8  ;;  %p678_p7 = scmp.lt.s32.totalorder %s676_s24, %s670_s28 }
 0x16a   : > { %p673_p13 = pneg %p672_p12  ;;  %p679_p1 = por %p678_p7, %p677_p3 }
 0x16c   : > { %p680_p2 = pnand %p679_p1, %p673_p13 }
 0x16e   : > { %683 = shalt.err (!%p680_p2)
}
 0x16f   : > { %s684_s16 = scalar_lea.hbm %s985_s10, 128  ;;  %s688_s22 = scalar_lea.hbm %s1037_s3, 256 }
 0x170   : > { %p685_p4 = scmp.ne.s32.totalorder %s985_s10, %s684_s16  ;;  %p689_p6 = scmp.lt.u32.totalorder %s985_s10, %s1037_s3 }
 0x171   : > { %p690_p0 = scmp.lt.u32.totalorder %s688_s22, %s684_s16  ;;  %p692_p10 = scmp.lt.u32.totalorder %s684_s16, %s985_s10 }
 0x172   : > { %p686_p9 = pnand %p685_p4, %p904_p8 }
 0x173   : > { %p691_p11 = por %p690_p0, %p689_p6 }
 0x174   : > { %p687_p5 = pneg %p686_p9 }
 0x175   : > { %p693_p12 = por %p692_p10, %p691_p11 }
 0x177   : > { %p694_p13 = pnand %p693_p12, %p687_p5 }
 0x179   : > { %697 = shalt.err (!%p694_p13)
}
 0x17a   : > { %517 = dma.vmem_to_hbm [thread:$0]  (%p904_p8), %s360_s9, 128, %s985_s10, %s346_s11  }
 0x17b PF: > { %p534_p3 = scmp.ge.s32.totalorder %s772_s19, 2  ;;  %s371_s7 = sand.u32 1, %s744_s12  }
 0x17c   : > { %p1054_p7 = scmp.ne.s32.totalorder %s1045_s25, 0  ;;  %s372_s5 = scalar_lea.sflag [#allocation5], %s371_s7 }
 0x17e   : > { %p528_p1 = pnand %p534_p3, %p1054_p7 }
 0x180   : > { %739 = dma.done.wait (!%p528_p1), %s372_s5, 128  }
 0x181   : > { %741 = vsyncadd (!%p528_p1), %s372_s5, 4294967168  ;;  %s20_s19 = sadd.s32 1, %s772_s19   ;;  %s1055_s12 = smov %s748_s13 }
 0x182   : > { %p17_p2 = scmp.ge.s32.totalorder %s20_s19, 6   ;;  %s1056_s13 = smov %s752_s14 }
 0x183   : > { %s1057_s14 = smov %s921_s21  ;;  %s1058_s15 = smov %s764_s17 }
 0x184   : > { %s1059_s16 = smov %s768_s18  ;;  %s1060_s17 = smov %s1063_s30 }
 0x185   : > { %s1061_s18 = smov %s1067_s4  ;;  %19 = sbr.rel (!%p17_p2) target bundleno = 8 (0x8), region = 91 }
 0x18c   :  { %377 = vsyncpa [#allocation4], 1 }
 0x18d   :  { %379 = vsyncpa [#allocation4 + $0x1], 1 }
 0x18e   :  { %380 = vsyncpa [#allocation7], 1 }
 0x18f   :  { %381 = vsyncpa [#allocation5], 1 }
 0x190   :  { %383 = vsyncpa [#allocation5 + $0x1], 1 }

</bundles_post_ra>
